<compile_context>
chip_gen: v6e
topology: v6e:2x2x1
jax: 0.10.0
libtpu: 0.0.40
codegen_flags: <defaults>
</compile_context>

<pallas_src>
import jax
import jax.numpy as jnp
from jax.experimental import pallas as pl
from jax.experimental.pallas import tpu as pltpu


def _double_conv_kernel(x_ref, w1_ref, b1_ref, w2_ref, b2_ref, out_ref,
                        xpad, hpad):
    """One batch element of DoubleConv.

    x_ref  : (1, H, W*Cin)            input slab (W and Cin flattened onto lanes)
    w1_ref : (3, (W+2)*Cin,  W*Cout)  banded conv1 weights, one slice per dh tap
    b1_ref : (1, W*Cout)              conv1 bias tiled across W
    w2_ref : (3, (W+2)*Cout, W*Cout)  banded conv2 weights
    b2_ref : (1, W*Cout)              conv2 bias tiled across W
    out_ref: (1, H, W*Cout)           lane-dense output slab
    xpad   : (H+2, (W+2)*Cin)         zero-padded conv1 input scratch (VMEM)
    hpad   : (H+2, (W+2)*Cout)        zero-padded conv2 input scratch (VMEM)
    """
    H = x_ref.shape[1]
    WCin = x_ref.shape[2]
    WCout = out_ref.shape[2]
    Cin = (xpad.shape[1] - WCin) // 2
    Cout = (hpad.shape[1] - WCout) // 2

    # Scratches are tiny ((H+2) x a-few-hundred lanes); a full zero-fill every
    # step is a couple of dense row stores and keeps the halo correct no matter
    # which TensorCore ran the previous grid step (batch axis is "parallel").
    xpad[...] = jnp.zeros_like(xpad)
    hpad[...] = jnp.zeros_like(hpad)

    # ---- conv1 + ReLU: 3 banded matmuls, result is already (H, W*Cout) ----
    xpad[1:1 + H, Cin:Cin + WCin] = x_ref[0]
    h1 = (jnp.dot(xpad[0:H, :], w1_ref[0], preferred_element_type=jnp.float32)
          + jnp.dot(xpad[1:1 + H, :], w1_ref[1],
                    preferred_element_type=jnp.float32)
          + jnp.dot(xpad[2:2 + H, :], w1_ref[2],
                    preferred_element_type=jnp.float32))
    h1 = jnp.maximum(h1 + b1_ref[...], 0.0)          # full-lane epilogue

    # ---- conv2 + ReLU ----
    hpad[1:1 + H, Cout:Cout + WCout] = h1
    h2 = (jnp.dot(hpad[0:H, :], w2_ref[0], preferred_element_type=jnp.float32)
          + jnp.dot(hpad[1:1 + H, :], w2_ref[1],
                    preferred_element_type=jnp.float32)
          + jnp.dot(hpad[2:2 + H, :], w2_ref[2],
                    preferred_element_type=jnp.float32))
    h2 = jnp.maximum(h2 + b2_ref[...], 0.0)          # (H, W*Cout)

    out_ref[0] = h2.astype(out_ref.dtype)            # lane-dense unmasked store


def _banded_weights(w_oihw, W):
    """PyTorch (Cout, Cin, 3, 3) weights -> banded (3, (W+2)*Cin, W*Cout).

    B[dh, (w+dw)*Cin + c, w*Cout + co] = w_oihw[co, c, dh, dw], so that
    sum_dh xflat_padded[h+dh, :] @ B[dh] equals the SAME 3x3 conv output row h
    laid out as (W*Cout,) with co fastest.
    """
    Cout, Cin, KH, KW = w_oihw.shape
    w_hwio = jnp.transpose(w_oihw, (2, 3, 1, 0)).astype(jnp.float32)
    blocks = jnp.zeros((KH, W + 2, W, Cin, Cout), jnp.float32)
    wpos = jnp.arange(W)
    for dh in range(KH):
        for dw in range(KW):
            blocks = blocks.at[dh, wpos + dw, wpos].set(w_hwio[dh, dw])
    # (dh, row_block, col_block, Cin, Cout) -> (dh, row_block*Cin, col_block*Cout)
    return blocks.transpose(0, 1, 3, 2, 4).reshape(KH, (W + 2) * Cin, W * Cout)


def double_conv_pallas(x_nchw, w1, b1, w2, b2):
    """x_nchw: (N, Cin, H, W). Returns the DoubleConv output in NCHW."""
    N, Cin, H, W = x_nchw.shape
    Cout = w1.shape[0]

    # Layout glue kept only to preserve the PyTorch NCHW interface; in a real
    # model keep activations (N, H, W*C) end-to-end and precompute the weights.
    x_flat = jnp.transpose(x_nchw, (0, 2, 3, 1)).astype(jnp.float32)
    x_flat = x_flat.reshape(N, H, W * Cin)

    w1_b = _banded_weights(w1, W)                         # (3, (W+2)*Cin,  W*Cout)
    w2_b = _banded_weights(w2, W)                         # (3, (W+2)*Cout, W*Cout)
    b1_t = jnp.tile(b1.astype(jnp.float32), (W,)).reshape(1, W * Cout)
    b2_t = jnp.tile(b2.astype(jnp.float32), (W,)).reshape(1, W * Cout)

    out_flat = pl.pallas_call(
        _double_conv_kernel,
        out_shape=jax.ShapeDtypeStruct((N, H, W * Cout), jnp.float32),
        grid_spec=pltpu.PrefetchScalarGridSpec(
            num_scalar_prefetch=0,
            grid=(N,),
            in_specs=[
                pl.BlockSpec((1, H, W * Cin), lambda n: (n, 0, 0)),
                pl.BlockSpec((3, (W + 2) * Cin, W * Cout), lambda n: (0, 0, 0)),
                pl.BlockSpec((1, W * Cout), lambda n: (0, 0)),
                pl.BlockSpec((3, (W + 2) * Cout, W * Cout), lambda n: (0, 0, 0)),
                pl.BlockSpec((1, W * Cout), lambda n: (0, 0)),
            ],
            out_specs=pl.BlockSpec((1, H, W * Cout), lambda n: (n, 0, 0)),
            scratch_shapes=[
                pltpu.VMEM((H + 2, (W + 2) * Cin), jnp.float32),
                pltpu.VMEM((H + 2, (W + 2) * Cout), jnp.float32),
            ],
        ),
        compiler_params=pltpu.CompilerParams(
            dimension_semantics=("parallel",)),
    )(x_flat, w1_b, b1_t, w2_b, b2_t)

    # (N, H, W*Cout) -> (N, H, W, Cout) -> NCHW to match PyTorch's convention.
    out = out_flat.reshape(N, H, W, Cout)
    return jnp.transpose(out, (0, 3, 1, 2))


def _reference(x_nchw, w1, b1, w2, b2):
    """Pure-JAX reference (NCHW convs) for a correctness spot-check."""
    y = jax.lax.conv_general_dilated(
        x_nchw, w1, window_strides=(1, 1), padding="SAME",
        dimension_numbers=("NCHW", "OIHW", "NCHW"))
    y = jax.nn.relu(y + b1[None, :, None, None])
    y = jax.lax.conv_general_dilated(
        y, w2, window_strides=(1, 1), padding="SAME",
        dimension_numbers=("NCHW", "OIHW", "NCHW"))
    y = jax.nn.relu(y + b2[None, :, None, None])
    return y


if __name__ == "__main__":
    # Small shapes consistent with DoubleConv(in_channels=4, out_channels=8).
    N, Cin, Cout, H, W = 2, 4, 8, 16, 16

    key = jax.random.PRNGKey(0)
    kx, k1, k2, k3, k4 = jax.random.split(key, 5)

    x = jax.random.normal(kx, (N, Cin, H, W), dtype=jnp.float32)

    # Deterministic parameter init (uniform, a la PyTorch's default Conv2d init).
    bound1 = 1.0 / float(jnp.sqrt(Cin * 9))
    bound2 = 1.0 / float(jnp.sqrt(Cout * 9))
    w1 = jax.random.uniform(k1, (Cout, Cin, 3, 3), jnp.float32, -bound1, bound1)
    b1 = jax.random.uniform(k2, (Cout,), jnp.float32, -bound1, bound1)
    w2 = jax.random.uniform(k3, (Cout, Cout, 3, 3), jnp.float32, -bound2, bound2)
    b2 = jax.random.uniform(k4, (Cout,), jnp.float32, -bound2, bound2)

    out = double_conv_pallas(x, w1, b1, w2, b2)
    jax.block_until_ready(out)

    ref = _reference(x, w1, b1, w2, b2)
    assert out.shape == (N, Cout, H, W)
    assert jnp.allclose(out, ref, atol=2e-4, rtol=2e-4)

    print("KERNEL_OK")
</pallas_src>

<mosaic_0001>
module attributes {stable_mosaic.version = 11 : i64} {
  func.func @_double_conv_kernel(%arg0: i32, %arg1: memref<1x16x64xf32, #tpu.memory_space<vmem>>, %arg2: memref<3x72x128xf32, #tpu.memory_space<vmem>>, %arg3: memref<1x128xf32, #tpu.memory_space<vmem>>, %arg4: memref<3x144x128xf32, #tpu.memory_space<vmem>>, %arg5: memref<1x128xf32, #tpu.memory_space<vmem>>, %arg6: memref<1x16x128xf32, #tpu.memory_space<vmem>>, %arg7: memref<18x72xf32, #tpu.memory_space<vmem>>, %arg8: memref<18x144xf32, #tpu.memory_space<vmem>>) attributes {dimension_semantics = [#tpu.dimension_semantics<parallel>], iteration_bounds = array<i64: 2>, scalar_prefetch = 0 : i64, scratch_operands = 2 : i64, tpu.core_type = #tpu.core_type<tc>, window_params = [{transform_indices = @transform_0, window_bounds = array<i64: 1, 16, 64>}, {pipeline_mode = #tpu.pipeline_mode<synchronous>, transform_indices = @transform_1, window_bounds = array<i64: 3, 72, 128>}, {pipeline_mode = #tpu.pipeline_mode<synchronous>, transform_indices = @transform_2, window_bounds = array<i64: 1, 128>}, {pipeline_mode = #tpu.pipeline_mode<synchronous>, transform_indices = @transform_3, window_bounds = array<i64: 3, 144, 128>}, {pipeline_mode = #tpu.pipeline_mode<synchronous>, transform_indices = @transform_4, window_bounds = array<i64: 1, 128>}, {transform_indices = @transform_5, window_bounds = array<i64: 1, 16, 128>}]} {
    %cst = arith.constant 0.000000e+00 : f32
    %0 = vector.broadcast %cst : f32 to vector<18x72xf32>
    %c0 = arith.constant 0 : index
    %c0_0 = arith.constant 0 : index
    %1 = vector.load %arg7[%c0, %c0_0] : memref<18x72xf32, #tpu.memory_space<vmem>>, vector<18x72xf32>
    tpu.vector_store %arg7[%c0, %c0_0], %0 {strides = array<i32>} : memref<18x72xf32, #tpu.memory_space<vmem>>, vector<18x72xf32>,
    %cst_1 = arith.constant 0.000000e+00 : f32
    %2 = vector.broadcast %cst_1 : f32 to vector<18x144xf32>
    %c0_2 = arith.constant 0 : index
    %c0_3 = arith.constant 0 : index
    %3 = vector.load %arg8[%c0_2, %c0_3] : memref<18x144xf32, #tpu.memory_space<vmem>>, vector<18x144xf32>
    tpu.vector_store %arg8[%c0_2, %c0_3], %2 {strides = array<i32>} : memref<18x144xf32, #tpu.memory_space<vmem>>, vector<18x144xf32>,
    %c0_4 = arith.constant 0 : index
    %c0_5 = arith.constant 0 : index
    %c0_6 = arith.constant 0 : index
    %4 = vector.load %arg1[%c0_4, %c0_5, %c0_6] : memref<1x16x64xf32, #tpu.memory_space<vmem>>, vector<1x16x64xf32>
    %5 = vector.shape_cast %4 : vector<1x16x64xf32> to vector<16x64xf32>
    %c1 = arith.constant 1 : index
    %c4 = arith.constant 4 : index
    %6 = vector.load %arg7[%c1, %c4] : memref<18x72xf32, #tpu.memory_space<vmem>>, vector<16x64xf32>
    tpu.vector_store %arg7[%c1, %c4], %5 {strides = array<i32>} : memref<18x72xf32, #tpu.memory_space<vmem>>, vector<16x64xf32>,
    %c0_7 = arith.constant 0 : index
    %c0_8 = arith.constant 0 : index
    %7 = vector.load %arg7[%c0_7, %c0_8] : memref<18x72xf32, #tpu.memory_space<vmem>>, vector<16x72xf32>
    %c0_9 = arith.constant 0 : index
    %c0_10 = arith.constant 0 : index
    %c0_11 = arith.constant 0 : index
    %8 = vector.load %arg2[%c0_9, %c0_10, %c0_11] : memref<3x72x128xf32, #tpu.memory_space<vmem>>, vector<1x72x128xf32>
    %9 = vector.shape_cast %8 : vector<1x72x128xf32> to vector<72x128xf32>
    %cst_12 = arith.constant dense<0.000000e+00> : vector<16x128xf32>
    %10 = tpu.matmul %7, %9, %cst_12 {dimension_numbers = #tpu.dot_dimension_numbers<[1], [0], [0], [1], [0, 0, 1, 1], [], []>} : vector<16x72xf32>, vector<72x128xf32>, vector<16x128xf32> -> vector<16x128xf32>
    %c1_13 = arith.constant 1 : index
    %c0_14 = arith.constant 0 : index
    %11 = vector.load %arg7[%c1_13, %c0_14] : memref<18x72xf32, #tpu.memory_space<vmem>>, vector<16x72xf32>
    %c1_15 = arith.constant 1 : index
    %c0_16 = arith.constant 0 : index
    %c0_17 = arith.constant 0 : index
    %12 = vector.load %arg2[%c1_15, %c0_16, %c0_17] : memref<3x72x128xf32, #tpu.memory_space<vmem>>, vector<1x72x128xf32>
    %13 = vector.shape_cast %12 : vector<1x72x128xf32> to vector<72x128xf32>
    %cst_18 = arith.constant dense<0.000000e+00> : vector<16x128xf32>
    %14 = tpu.matmul %11, %13, %cst_18 {dimension_numbers = #tpu.dot_dimension_numbers<[1], [0], [0], [1], [0, 0, 1, 1], [], []>} : vector<16x72xf32>, vector<72x128xf32>, vector<16x128xf32> -> vector<16x128xf32>
    %15 = arith.addf %10, %14 : vector<16x128xf32>
    %c2 = arith.constant 2 : index
    %c0_19 = arith.constant 0 : index
    %16 = vector.load %arg7[%c2, %c0_19] : memref<18x72xf32, #tpu.memory_space<vmem>>, vector<16x72xf32>
    %c2_20 = arith.constant 2 : index
    %c0_21 = arith.constant 0 : index
    %c0_22 = arith.constant 0 : index
    %17 = vector.load %arg2[%c2_20, %c0_21, %c0_22] : memref<3x72x128xf32, #tpu.memory_space<vmem>>, vector<1x72x128xf32>
    %18 = vector.shape_cast %17 : vector<1x72x128xf32> to vector<72x128xf32>
    %cst_23 = arith.constant dense<0.000000e+00> : vector<16x128xf32>
    %19 = tpu.matmul %16, %18, %cst_23 {dimension_numbers = #tpu.dot_dimension_numbers<[1], [0], [0], [1], [0, 0, 1, 1], [], []>} : vector<16x72xf32>, vector<72x128xf32>, vector<16x128xf32> -> vector<16x128xf32>
    %20 = arith.addf %15, %19 : vector<16x128xf32>
    %c0_24 = arith.constant 0 : index
    %c0_25 = arith.constant 0 : index
    %21 = vector.load %arg3[%c0_24, %c0_25] : memref<1x128xf32, #tpu.memory_space<vmem>>, vector<1x128xf32>
    %22 = vector.broadcast %21 : vector<1x128xf32> to vector<16x128xf32>
    %23 = arith.addf %20, %22 : vector<16x128xf32>
    %cst_26 = arith.constant 0.000000e+00 : f32
    %24 = vector.broadcast %cst_26 : f32 to vector<16x128xf32>
    %25 = arith.maximumf %23, %24 : vector<16x128xf32>
    %c1_27 = arith.constant 1 : index
    %c8 = arith.constant 8 : index
    %26 = vector.load %arg8[%c1_27, %c8] : memref<18x144xf32, #tpu.memory_space<vmem>>, vector<16x128xf32>
    tpu.vector_store %arg8[%c1_27, %c8], %25 {strides = array<i32>} : memref<18x144xf32, #tpu.memory_space<vmem>>, vector<16x128xf32>,
    %c0_28 = arith.constant 0 : index
    %c0_29 = arith.constant 0 : index
    %27 = vector.load %arg8[%c0_28, %c0_29] : memref<18x144xf32, #tpu.memory_space<vmem>>, vector<16x144xf32>
    %c0_30 = arith.constant 0 : index
    %c0_31 = arith.constant 0 : index
    %c0_32 = arith.constant 0 : index
    %28 = vector.load %arg4[%c0_30, %c0_31, %c0_32] : memref<3x144x128xf32, #tpu.memory_space<vmem>>, vector<1x144x128xf32>
    %29 = vector.shape_cast %28 : vector<1x144x128xf32> to vector<144x128xf32>
    %cst_33 = arith.constant dense<0.000000e+00> : vector<16x128xf32>
    %30 = tpu.matmul %27, %29, %cst_33 {dimension_numbers = #tpu.dot_dimension_numbers<[1], [0], [0], [1], [0, 0, 1, 1], [], []>} : vector<16x144xf32>, vector<144x128xf32>, vector<16x128xf32> -> vector<16x128xf32>
    %c1_34 = arith.constant 1 : index
    %c0_35 = arith.constant 0 : index
    %31 = vector.load %arg8[%c1_34, %c0_35] : memref<18x144xf32, #tpu.memory_space<vmem>>, vector<16x144xf32>
    %c1_36 = arith.constant 1 : index
    %c0_37 = arith.constant 0 : index
    %c0_38 = arith.constant 0 : index
    %32 = vector.load %arg4[%c1_36, %c0_37, %c0_38] : memref<3x144x128xf32, #tpu.memory_space<vmem>>, vector<1x144x128xf32>
    %33 = vector.shape_cast %32 : vector<1x144x128xf32> to vector<144x128xf32>
    %cst_39 = arith.constant dense<0.000000e+00> : vector<16x128xf32>
    %34 = tpu.matmul %31, %33, %cst_39 {dimension_numbers = #tpu.dot_dimension_numbers<[1], [0], [0], [1], [0, 0, 1, 1], [], []>} : vector<16x144xf32>, vector<144x128xf32>, vector<16x128xf32> -> vector<16x128xf32>
    %35 = arith.addf %30, %34 : vector<16x128xf32>
    %c2_40 = arith.constant 2 : index
    %c0_41 = arith.constant 0 : index
    %36 = vector.load %arg8[%c2_40, %c0_41] : memref<18x144xf32, #tpu.memory_space<vmem>>, vector<16x144xf32>
    %c2_42 = arith.constant 2 : index
    %c0_43 = arith.constant 0 : index
    %c0_44 = arith.constant 0 : index
    %37 = vector.load %arg4[%c2_42, %c0_43, %c0_44] : memref<3x144x128xf32, #tpu.memory_space<vmem>>, vector<1x144x128xf32>
    %38 = vector.shape_cast %37 : vector<1x144x128xf32> to vector<144x128xf32>
    %cst_45 = arith.constant dense<0.000000e+00> : vector<16x128xf32>
    %39 = tpu.matmul %36, %38, %cst_45 {dimension_numbers = #tpu.dot_dimension_numbers<[1], [0], [0], [1], [0, 0, 1, 1], [], []>} : vector<16x144xf32>, vector<144x128xf32>, vector<16x128xf32> -> vector<16x128xf32>
    %40 = arith.addf %35, %39 : vector<16x128xf32>
    %c0_46 = arith.constant 0 : index
    %c0_47 = arith.constant 0 : index
    %41 = vector.load %arg5[%c0_46, %c0_47] : memref<1x128xf32, #tpu.memory_space<vmem>>, vector<1x128xf32>
    %42 = vector.broadcast %41 : vector<1x128xf32> to vector<16x128xf32>
    %43 = arith.addf %40, %42 : vector<16x128xf32>
    %cst_48 = arith.constant 0.000000e+00 : f32
    %44 = vector.broadcast %cst_48 : f32 to vector<16x128xf32>
    %45 = arith.maximumf %43, %44 : vector<16x128xf32>
    %c0_49 = arith.constant 0 : index
    %c0_50 = arith.constant 0 : index
    %c0_51 = arith.constant 0 : index
    %46 = vector.load %arg6[%c0_49, %c0_50, %c0_51] : memref<1x16x128xf32, #tpu.memory_space<vmem>>, vector<1x16x128xf32>
    %47 = vector.shape_cast %46 : vector<1x16x128xf32> to vector<16x128xf32>
    %48 = vector.shape_cast %45 : vector<16x128xf32> to vector<1x16x128xf32>
    tpu.vector_store %arg6[%c0_49, %c0_50, %c0_51], %48 {strides = array<i32>} : memref<1x16x128xf32, #tpu.memory_space<vmem>>, vector<1x16x128xf32>,
    return
  }
  func.func @transform_0(%arg0: i32) -> (i32, i32, i32) {
    %c0_i32 = arith.constant 0 : i32
    %c0_i32_0 = arith.constant 0 : i32
    %c0_i32_1 = arith.constant 0 : i32
    return %arg0, %c0_i32, %c0_i32_0 : i32, i32, i32
  }
  func.func @transform_1(%arg0: i32) -> (i32, i32, i32) {
    %c0_i32 = arith.constant 0 : i32
    %c0_i32_0 = arith.constant 0 : i32
    %c0_i32_1 = arith.constant 0 : i32
    %c0_i32_2 = arith.constant 0 : i32
    return %c0_i32, %c0_i32_0, %c0_i32_1 : i32, i32, i32
  }
  func.func @transform_2(%arg0: i32) -> (i32, i32) {
    %c0_i32 = arith.constant 0 : i32
    %c0_i32_0 = arith.constant 0 : i32
    %c0_i32_1 = arith.constant 0 : i32
    return %c0_i32, %c0_i32_0 : i32, i32
  }
  func.func @transform_3(%arg0: i32) -> (i32, i32, i32) {
    %c0_i32 = arith.constant 0 : i32
    %c0_i32_0 = arith.constant 0 : i32
    %c0_i32_1 = arith.constant 0 : i32
    %c0_i32_2 = arith.constant 0 : i32
    return %c0_i32, %c0_i32_0, %c0_i32_1 : i32, i32, i32
  }
  func.func @transform_4(%arg0: i32) -> (i32, i32) {
    %c0_i32 = arith.constant 0 : i32
    %c0_i32_0 = arith.constant 0 : i32
    %c0_i32_1 = arith.constant 0 : i32
    return %c0_i32, %c0_i32_0 : i32, i32
  }
  func.func @transform_5(%arg0: i32) -> (i32, i32, i32) {
    %c0_i32 = arith.constant 0 : i32
    %c0_i32_0 = arith.constant 0 : i32
    %c0_i32_1 = arith.constant 0 : i32
    return %arg0, %c0_i32, %c0_i32_0 : i32, i32, i32
  }
}

</mosaic_0001>

<bundles_post_ra>
// kernel: tpu_custom_call.1
= control target key start
LH: loop header
LB: loop body
LE: loop exit
PB: predicated region body
PF: predicated region fallthrough
CT: control target
= control target key end

     0   :  { %10 = vsyncpa [#allocation5], 0  ;;  %s1784_s0 = inlined_call_operand.hbm [shape: f32[2,16,64], index: 0, kind: input, shape index: {}]   ;;  %s1785_s1 = inlined_call_operand.hbm [shape: f32[3,72,128], index: 1, kind: input, shape index: {}]   ;;  %s1786_s2 = inlined_call_operand.vmem [shape: f32[1,128], index: 2, kind: input, shape index: {}]   ;;  %s1787_s3 = inlined_call_operand.hbm [shape: f32[3,144,128], index: 3, kind: input, shape index: {}]   ;;  %s1788_s4 = inlined_call_operand.vmem [shape: f32[1,128], index: 4, kind: input, shape index: {}]   ;;  %s1789_s5 = inlined_call_operand.hbm [shape: f32[2,16,128], index: 5, kind: output, shape index: {}]  }
   0x1   :  { %12 = vsyncpa [#allocation5 + $0x1], 0 }
   0x2   :  { %13 = vsyncpa [#allocation8], 0 }
   0x3   :  { %14 = vsyncpa [#allocation6], 0 }
   0x4   :  { %16 = vsyncpa [#allocation6 + $0x1], 0  ;;  %s1472_s18 = smov 0   ;;  %s1474_s19 = smov 0  }
   0x5   :  { %s1476_s20 = smov 0   ;;  %s1478_s21 = smov 0  }
   0x6 LB: > { %s1493_s22 = sadd.s32 4294967295, %s1430_s21   ;;  %s1079_s23 = sadd.s32 4294967294, %s1430_s21   ;;  %s1430_s21 = sphi %s1478_s21, %s1812_s21   ;;  %s1426_s20 = sphi %s1476_s20, %s1811_s20   ;;  %s1422_s19 = sphi %s1474_s19, %s1810_s19   ;;  %s1418_s18 = sphi %s1472_s18, %s1809_s18  }
   0x7   : > { %p42_p0 = scmp.ne.s32.totalorder %s1422_s19, %s1418_s18  ;;  %p1790_p1 = scmp.eq.s32.totalorder %s1493_s22, 0 }
   0x8   : > { %p150_p2 = scmp.eq.s32.totalorder %s1493_s22, 1  ;;  %p156_p3 = scmp.eq.s32.totalorder %s1079_s23, 1 }
   0x9   : > { %p1502_p4 = por %p1790_p1, %p42_p0  ;;  %p1080_p5 = scmp.ge.s32.totalorder %s1430_s21, 1 }
   0xa   : > { %p1507_p6 = por %p156_p3, %p42_p0  ;;  %p163_p7 = scmp.lt.s32.totalorder %s1430_s21, 3 }
   0xb   : > { %s1795_s24 = scalar_select %p1502_p4, 1, 0 }
   0xc   : > { %s1796_s25 = scalar_select %p1507_p6, 1, 0 }
   0xd   : > { %p1512_p8 = pnand %p1080_p5, %p163_p7  ;;  %s1432_s27 = smov [#allocation7]  }
   0xe   : > { %s175_s28 = sshll.u32 %s1432_s27, 4  ;;  %s1433_s30 = smov [#allocation9]   ;;  %s176_s28 = int_to_ptr.vmem [resolvable:$true] %s175_s28 }
   0xf   : > { %s1797_s26 = scalar_select %p1512_p8, 1, 0 }
  0x10   : > { %p1221_p9 = pneg %p1512_p8  ;;  %s191_s6 = sshll.u32 %s1433_s30, 4  ;;  %s192_s6 = int_to_ptr.vmem [resolvable:$true] %s191_s6 }
  0x11   : > { %s1293_s7 = scalar_lea.vmem %s176_s28, 3456  ;;  %p1301_p5 = scmp.lt.s32.totalorder %s176_s28, %s176_s28 }
  0x12   : > { %p1521_p11 = pnand %p1221_p9, %p1790_p1  ;;  %p1294_p13 = scmp.ne.s32.totalorder %s176_s28, %s1293_s7 }
  0x13   : > { %p1302_p7 = scmp.lt.s32.totalorder %s1293_s7, %s1293_s7 }
  0x14   : > { %p1284_p12 = pneg %p1521_p11 }
  0x15   : > { %p1303_p10 = por %p1302_p7, %p1301_p5 }
  0x16   : > { %p1296_p0 = pnand %p1294_p13, %p1284_p12 }
  0x18   : > { %p1297_p3 = pneg %p1296_p0 }
  0x1a   : > { %p1304_p9 = pnand %p1303_p10, %p1297_p3 }
  0x1c   : > { %1307 = shalt.err (!%p1304_p9)
}
  0x1d   : > { %s1791_s8 = smov 128   ;;  %s1435_s9 = smov 8  }
  0x1e   : > { %1224 = dma.hbm_to_vmem [thread:$0]  (!%p1521_p11), %s1785_s1, 3456, %s176_s28, [#allocation8], %s1791_s8, %s1791_s8, %s1435_s9  }
  0x1f   : > { %s1319_s12 = scalar_lea.vmem %s192_s6, 6912  ;;  %p1327_p10 = scmp.lt.s32.totalorder %s192_s6, %s192_s6 }
  0x20   : > { %p1320_p13 = scmp.ne.s32.totalorder %s192_s6, %s1319_s12  ;;  %p1328_p3 = scmp.lt.s32.totalorder %s1319_s12, %s1319_s12 }
  0x22   : > { %p1322_p0 = pnand %p1320_p13, %p1284_p12  ;;  %p1329_p7 = por %p1328_p3, %p1327_p10 }
  0x24   : > { %p1323_p5 = pneg %p1322_p0 }
  0x26   : > { %p1330_p9 = pnand %p1329_p7, %p1323_p5 }
  0x28   : > { %1333 = shalt.err (!%p1330_p9)
}
  0x29   : > { %1227 = dma.hbm_to_vmem [thread:$0]  (!%p1521_p11), %s1787_s3, 6912, %s192_s6, [#allocation8], %s1791_s8, %s1791_s8, %s1435_s9  }
  0x2a   : > { %s1550_s15 = sadd.s32 1, %s1430_s21   ;;  %s29_s16 = sadd.s32 1, %s1426_s20 }
  0x2b   : > { %s26_s17 = ssub.s32 %s1430_s21, %s1550_s15  ;;  %p36_p12 = scmp.ne.s32.totalorder %s1426_s20, %s1422_s19 }
  0x2c   : > { %p27_p13 = scmp.eq.s32.totalorder %s26_s17, 0  ;;  %p37_p0 = scmp.eq.s32.totalorder %s1430_s21, 0 }
  0x2d   : > { %p1560_p5 = por %p150_p2, %p36_p12  ;;  %p1238_p10 = scmp.lt.s32.totalorder %s1430_s21, 2 }
  0x2e   : > { %s1566_s27 = scalar_select %p27_p13, %s1426_s20, %s29_s16  }
  0x2f   : > { %s1799_s23 = scalar_select %p1560_p5, 1, 0 }
  0x30   : > { %p38_p3 = por %p37_p0, %p36_p12  ;;  %s208_s28 = sand.u32 1, %s1426_s20  }
  0x31   : > { %s1084_s29 = sshll.u32 %s208_s28, 4  ;;  %s1111_s30 = sshll.u32 %s1430_s21, 8 }
  0x32   : > { %s1573_s10 = scalar_lea.hbm %s1784_s0, %s1111_s30  ;;  %s212_s11 = scalar_lea.vmem [#allocation4], %s1084_s29 }
  0x33   : > { %s219_s12 = sshll.u32 %s212_s11, 4  ;;  %p1577_p2 = pnand %p1238_p10, %p38_p3  ;;  %s1575_s12 = int_to_ptr.vmem [resolvable:$true] %s219_s12 }
  0x34   : > { %s1581_s14 = scalar_lea.sflag [#allocation5], %s208_s28  ;;  %s1334_s16 = scalar_lea.hbm %s1573_s10, 256 }
  0x35   : > { %p1335_p11 = scmp.ne.s32.totalorder %s1573_s10, %s1334_s16  ;;  %p1336_p7 = pneg %p1577_p2 }
  0x36   : > { %s1339_s29 = scalar_lea.hbm %s1784_s0, 512  ;;  %p1340_p13 = scmp.lt.s32.totalorder %s1573_s10, %s1784_s0 }
  0x37   : > { %p1337_p9 = pnand %p1336_p7, %p1335_p11  ;;  %p1341_p0 = scmp.lt.s32.totalorder %s1339_s29, %s1334_s16 }
  0x39   : > { %p1338_p12 = pneg %p1337_p9  ;;  %p1342_p10 = por %p1341_p0, %p1340_p13 }
  0x3b   : > { %p1343_p3 = pnand %p1342_p10, %p1338_p12 }
  0x3d   : > { %1346 = shalt.err (!%p1343_p3)
}
  0x3e   : > { %s1347_s28 = scalar_lea.vmem %s1575_s12, 256  ;;  %s1436_s11 = smov [#allocation4]  }
  0x3f   : > { %p1348_p1 = scmp.ne.s32.totalorder %s1575_s12, %s1347_s28  ;;  %s1352_s8 = sshll.u32 %s1436_s11, 4  ;;  %s1353_s8 = int_to_ptr.vmem [resolvable:$false] %s1352_s8 }
  0x40   : > { %s1354_s17 = scalar_lea.vmem %s1353_s8, 512  ;;  %p1355_p9 = scmp.lt.s32.totalorder %s1575_s12, %s1353_s8 }
  0x41   : > { %p1350_p6 = pnand %p1348_p1, %p1336_p7  ;;  %p1356_p5 = scmp.lt.s32.totalorder %s1354_s17, %s1347_s28 }
  0x43   : > { %p1351_p11 = pneg %p1350_p6  ;;  %p1357_p4 = por %p1356_p5, %p1355_p9 }
  0x45   : > { %p1358_p8 = pnand %p1357_p4, %p1351_p11 }
  0x47   : > { %1361 = shalt.err (!%p1358_p8)
}
  0x48   : > { %s1801_s16 = smov 128   ;;  %p1802_p1 = scmp.ne.s32.totalorder %s1797_s26, 0 }
  0x49   : > { %1231 = dma.hbm_to_vmem [thread:$0]  (!%p1577_p2), %s1573_s10, 256, %s1575_s12, %s1581_s14, %s1801_s16, %s1801_s16, %s1435_s9  }
  0x4a   : > { %231 = sbr.rel (%p1802_p1) target bundleno = 817 (0x331), region = 40  ;;  %s1608_s30 = sand.u32 (!%p1802_p1), 1, %s1422_s19  }
  0x4b   : > { %s1088_s8 = sshll.u32 (!%p1802_p1), %s1608_s30, 4  ;;  %s234_s29 = scalar_lea.sflag (!%p1802_p1), [#allocation5], %s1608_s30 }
  0x4c   : > { %s237_s13 = scalar_lea.vmem (!%p1802_p1), [#allocation4], %s1088_s8  ;;  %p1803_p4 = scmp.ne.s32.totalorder (!%p1802_p1), %s1795_s24, 0 }
  0x4f   : > { %1405 = dma.done.wait (%p1803_p4), %s234_s29, 256  }
  0x50   : > { %1407 = vsyncadd (%p1803_p4), %s234_s29, 4294967040  ;;  %p1804_p6 = scmp.eq.s32.totalorder %s1493_s22, 0 }
  0x52   : > { %1409 = dma.done.wait (%p1804_p6), [#allocation8], 10368   ;;  %p1805_p8 = pmov %p1804_p6 }
  0x53   : > { %vm272_vm0 = vcmask 588800   ;;  %v1437_v0 = vmov 0.0   ;;  %vm275_vm1 = vcmask 582656   ;;  %v285_v1 = vld [vmem:[%s237_s13] sm:$0xff]  ;;  %v320_v2 = vld [vmem:[#allocation7 + $0x88] sm:$0xff]  ;;  %s1438_s24 = smov 4  }
  0x54   : > { %1411 = vsyncadd (%p1805_p8), [#allocation8], 4294956928  ;;  %273 = vst.msk [vmem:[#allocation2] sm:$0xff] %vm272_vm0, %v1437_v0  ;;  %289 = vrot.lane.b32.xlu0 %v285_v1, %s1438_s24  ;;  %1146 = vmatprep.subr.mxu0 %v320_v2  ;;  %v308_v3 = vld [vmem:[#allocation7 + $0x40] sm:$0xff]  ;;  %v307_v5 = vld [vmem:[#allocation7 + $0x38] sm:$0xff]  ;;  %vm295_vm2 = vcmask 556064  }
  0x55   : > { %274 = vst.msk [vmem:[#allocation2 + $0x8] sm:$0xff] %vm272_vm0, %v1437_v0  ;;  %277 = vst [vmem:[#allocation3] sm:$0xff] %v1437_v0  ;;  %v319_v4 = vld [vmem:[#allocation7 + $0x80] sm:$0xff]  ;;  %v286_v6 = vld [vmem:[%s237_s13 + $0x8] sm:$0xff]  ;;  %1147 = vmatpush3.msra.mxu0 %v320_v2  ;;  %1167 = vmatprep.subr.mxu1 %v308_v3  ;;  %vm283_vm3 = vcmask 123904   ;;  %vm278_vm4 = vcmask 130048  }
  0x56   : > { %280 = vst [vmem:[#allocation3 + $0x10] sm:$0xff] %v1437_v0  ;;  %282 = vst [vmem:[#allocation3 + $0x20] sm:$0x3] %v1437_v0  ;;  %v318_v7 = vld [vmem:[#allocation7 + $0x78] sm:$0xff]  ;;  %1148 = vmatprep.subr.mxu0 %v319_v4  ;;  %1168 = vmatpush3.msra.mxu1 %v308_v3  ;;  %v306_v8 = vld [vmem:[#allocation7 + $0x30] sm:$0xff]  ;;  %s1439_s10 = smov 8  }
  0x57   : > { %276 = vst.msk [vmem:[#allocation2 + $0x10] sm:$0x3] %vm275_vm1, %v1437_v0  ;;  %1149 = vmatpush3.msra.mxu0 %v319_v4  ;;  %1169 = vmatprep.subr.mxu1 %v307_v5  ;;  %v317_v9 = vld [vmem:[#allocation7 + $0x70] sm:$0xff]  ;;  %v305_v10 = vld [vmem:[#allocation7 + $0x28] sm:$0xff]  ;;  %v304_v12 = vld [vmem:[#allocation7 + $0x20] sm:$0xff]  ;;  %vm591_vm5 = vcmask 1040384  }
  0x58   : > { %291 = vrot.lane.b32.xlu0 %v286_v6, %s1438_s24  ;;  %1150 = vmatprep.subr.mxu0 %v318_v7  ;;  %v316_v11 = vld [vmem:[#allocation7 + $0x68] sm:$0xff]  ;;  %v315_v13 = vld [vmem:[#allocation7 + $0x60] sm:$0xff]  ;;  %v303_v14 = vld [vmem:[#allocation7 + $0x18] sm:$0xff]  ;;  %284 = vst.msk [vmem:[#allocation3 + $0x28] sm:$0x3] %vm283_vm3, %v1437_v0  ;;  %vm612_vm6 = vcmask 1040448  }
  0x59   : > { %1170 = vmatpush3.msra.mxu1 %v307_v5  ;;  %1151 = vmatpush3.msra.mxu0 %v318_v7  ;;  %v314_v15 = vld [vmem:[#allocation7 + $0x58] sm:$0xff]  ;;  %v302_v16 = vld [vmem:[#allocation7 + $0x10] sm:$0xff]  ;;  %v301_v18 = vld [vmem:[#allocation7 + $0x8] sm:$0xff]  ;;  %279 = vst.msk [vmem:[#allocation3 + $0x8] sm:$0xff] %vm278_vm4, %v1437_v0  ;;  %vm614_vm7 = vcmask 57344   ;;  %vm604_vm8 = vcmask 1047617  }
  0x5a   : > { %1171 = vmatprep.subr.mxu1 %v306_v8  ;;  %1152 = vmatprep.subr.mxu0 %v317_v9  ;;  %v313_v17 = vld [vmem:[#allocation7 + $0x50] sm:$0xff]  ;;  %v312_v19 = vld [vmem:[#allocation7 + $0x48] sm:$0xff]  ;;  %v300_v20 = vld [vmem:[#allocation7] sm:$0xff]  ;;  %281 = vst.msk [vmem:[#allocation3 + $0x18] sm:$0xff] %vm278_vm4, %v1437_v0  ;;  %vm606_vm9 = vcmask 64513   ;;  %vm608_vm10 = vcmask 1047616  }
  0x5b   : > { %1172 = vmatpush3.msra.mxu1 %v306_v8  ;;  %1153 = vmatpush3.msra.mxu0 %v317_v9  ;;  %v494_v21 = vld [vmem:[#allocation7 + $0xd0] sm:$0xff]  ;;  %v493_v26 = vld [vmem:[#allocation7 + $0xc8] sm:$0xff]  ;;  %v492_v30 = vld [vmem:[#allocation7 + $0xc0] sm:$0xff]  ;;  %vm610_vm11 = vcmask 64512   ;;  %vm667_vm12 = vcmask 1046528   ;;  %vm866_vm13 = vcmask 1045504  }
  0x5c   : > { %1173 = vmatprep.subr.mxu1 %v305_v10  ;;  %1154 = vmatprep.subr.mxu0 %v316_v11  ;;  %v491_v31 = vld [vmem:[#allocation7 + $0xb8] sm:$0xff]  ;;  %v490_v32 = vld [vmem:[#allocation7 + $0xb0] sm:$0xff]  ;;  %v489_v33 = vld [vmem:[#allocation7 + $0xa8] sm:$0xff]  ;;  %s271_s6 = scalar_lea.vmem [#allocation10], %s1088_s8  ;;  %s1112_s28 = sshll.u32 %s1493_s22, 8 }
  0x5d   : > { %1174 = vmatpush3.msra.mxu1 %v305_v10  ;;  %1155 = vmatpush3.msra.mxu0 %v316_v11  ;;  %v488_v34 = vld [vmem:[#allocation7 + $0xa0] sm:$0xff]  ;;  %v487_v35 = vld [vmem:[#allocation7 + $0x98] sm:$0xff]  ;;  %v486_v36 = vld [vmem:[#allocation7 + $0x90] sm:$0xff]  ;;  %s987_s7 = sshll.u32 %s271_s6, 4  ;;  %s1740_s16 = scalar_lea.hbm %s1789_s5, %s1112_s28  ;;  %s1735_s7 = int_to_ptr.vmem [resolvable:$true] %s987_s7 }
  0x5e   : > { %1175 = vmatprep.subr.mxu1 %v304_v12  ;;  %1156 = vmatprep.subr.mxu0 %v315_v13  ;;  %v635_v38 = vld [vmem:[#allocation9 + $0x78] sm:$0xff]  ;;  %v634_v39 = vld [vmem:[#allocation9 + $0x70] sm:$0xff]  ;;  %v658_v40 = vld [vmem:[#allocation9 + $0x108] sm:$0xff]  ;;  %s974_s29 = scalar_lea.sflag [#allocation6], %s1608_s30  ;;  %s1362_s8 = scalar_lea.vmem %s1735_s7, 256 }
  0x5f   : > { %1176 = vmatpush3.msra.mxu1 %v304_v12  ;;  %1157 = vmatpush3.msra.mxu0 %v315_v13  ;;  %v657_v41 = vld [vmem:[#allocation9 + $0x100] sm:$0xff]  ;;  %v633_v42 = vld [vmem:[#allocation9 + $0x68] sm:$0xff]  ;;  %v656_v43 = vld [vmem:[#allocation9 + $0xf8] sm:$0xff]  ;;  %p1363_p5 = scmp.ne.s32.totalorder %s1735_s7, %s1362_s8  ;;  %p1806_p2 = scmp.ne.s32.totalorder %s1799_s23, 0 }
  0x60   : > { %1177 = vmatprep.subr.mxu1 %v303_v14  ;;  %1158 = vmatprep.subr.mxu0 %v314_v15  ;;  %v632_v44 = vld [vmem:[#allocation9 + $0x60] sm:$0xff]  ;;  %v655_v45 = vld [vmem:[#allocation9 + $0xf0] sm:$0xff]  ;;  %v631_v46 = vld [vmem:[#allocation9 + $0x58] sm:$0xff]  ;;  %s1440_s22 = smov [#allocation10]  }
  0x61   : > { %1178 = vmatpush3.msra.mxu1 %v303_v14  ;;  %1159 = vmatpush3.msra.mxu0 %v314_v15  ;;  %v654_v47 = vld [vmem:[#allocation9 + $0xe8] sm:$0xff]  ;;  %v630_v48 = vld [vmem:[#allocation9 + $0x50] sm:$0xff]  ;;  %v653_v49 = vld [vmem:[#allocation9 + $0xe0] sm:$0xff]  ;;  %p1364_p7 = pnand %p1363_p5, %p1806_p2  ;;  %s1366_s13 = sshll.u32 %s1440_s22, 4  ;;  %s1367_s13 = int_to_ptr.vmem [resolvable:$false] %s1366_s13 }
  0x62   : > { %1179 = vmatprep.subr.mxu1 %v302_v16  ;;  %1160 = vmatprep.subr.mxu0 %v313_v17  ;;  %v629_v50 = vld [vmem:[#allocation9 + $0x48] sm:$0xff]  ;;  %v652_v51 = vld [vmem:[#allocation9 + $0xd8] sm:$0xff]  ;;  %v628_v52 = vld [vmem:[#allocation9 + $0x40] sm:$0xff]  ;;  %s1368_s24 = scalar_lea.vmem %s1367_s13, 512  ;;  %p1369_p13 = scmp.lt.s32.totalorder %s1735_s7, %s1367_s13 }
  0x63   : > { %1180 = vmatpush3.msra.mxu1 %v302_v16  ;;  %1161 = vmatpush3.msra.mxu0 %v313_v17  ;;  %v651_v53 = vld [vmem:[#allocation9 + $0xd0] sm:$0xff]  ;;  %v627_v54 = vld [vmem:[#allocation9 + $0x38] sm:$0xff]  ;;  %v650_v55 = vld [vmem:[#allocation9 + $0xc8] sm:$0xff]  ;;  %p1365_p12 = pneg %p1364_p7  ;;  %p1370_p0 = scmp.lt.s32.totalorder %s1368_s24, %s1362_s8 }
  0x64   : > { %1181 = vmatprep.subr.mxu1 %v301_v18  ;;  %1162 = vmatprep.subr.mxu0 %v312_v19  ;;  %v626_v56 = vld [vmem:[#allocation9 + $0x30] sm:$0xff]  ;;  %v625_v57 = vld [vmem:[#allocation9 + $0x28] sm:$0xff]  ;;  %v624_v58 = vld [vmem:[#allocation9 + $0x20] sm:$0xff] }
  0x65   : > { %1182 = vmatpush3.msra.mxu1 %v301_v18  ;;  %1163 = vmatpush3.msra.mxu0 %v312_v19  ;;  %v649_v61 = vld [vmem:[#allocation9 + $0xc0] sm:$0xff]  ;;  %v623_v62 = vld [vmem:[#allocation9 + $0x18] sm:$0xff]  ;;  %v622_v1 = vld [vmem:[#allocation9 + $0x10] sm:$0xff]  ;;  %p1371_p10 = por %p1370_p0, %p1369_p13 }
  0x66   : > { %1183 = vmatprep.subr.mxu1 %v300_v20  ;;  %1188 = vmatprep.subr.mxu0 %v494_v21  ;;  %v648_v63 = vld [vmem:[#allocation9 + $0xb8] sm:$0xff]  ;;  %v647_v4 = vld [vmem:[#allocation9 + $0xb0] sm:$0xff]  ;;  %v621_v5 = vld [vmem:[#allocation9 + $0x8] sm:$0xff] }
  0x67   : > { %1184 = vmatpush3.msra.mxu1 %v300_v20  ;;  %v1098_v8 = vld [vmem:[%s1786_s2] ss:$0 sm:$0xff]  ;;  %v646_v11 = vld [vmem:[#allocation9 + $0xa8] sm:$0xff]  ;;  %v644_v18 = vld [vmem:[#allocation9 + $0x98] sm:$0xff]  ;;  %p1372_p3 = pnand %p1371_p10, %p1365_p12 }
  0x68   : > { %684 = vmatprep.subr.mxu1 %v1437_v0  ;;  %v620_v12 = vld [vmem:[#allocation9] sm:$0xff]  ;;  %v637_v15 = vld [vmem:[#allocation9 + $0x88] sm:$0xff] }
  0x69   : > { %v645_v14 = vld [vmem:[#allocation9 + $0xa0] sm:$0xff] }
  0x6a   : > { %v636_v19 = vld [vmem:[#allocation9 + $0x80] sm:$0xff] }
  0xc6   : > { %v290_v22 = vpop.permute.xlu0 %289 }
  0xc7   : > { %296 = vst.msk [vmem:[#allocation2 + $0x1] sm:$0xff] %vm295_vm2, %v290_v22 }
  0xca   : > { %v292_v23 = vpop.permute.xlu0 %291 }
  0xcb   : > { %297 = vst.msk [vmem:[#allocation2 + $0x9] sm:$0xff] %vm295_vm2, %v292_v23 }
  0xce   : > { %v309_v24 = vld [vmem:[#allocation2 + $0x1] sm:$0xff] }
  0xcf   : > { %v298_v25 = vld [vmem:[#allocation2] sm:$0xff]  ;;  %1164 = vmatprep.mubr.msk.f32.mxu0 %vm272_vm0, %v309_v24  ;;  %v643_v24 = vld [vmem:[#allocation9 + $0x90] sm:$0xff] }
  0xd0   : > { %1185 = vmatprep.mubr.msk.f32.mxu1 %vm272_vm0, %v298_v25  ;;  %v660_v25 = vld [vmem:[#allocation9 + $0x118] sm:$0xff] }
  0xd2   : > { %v310_v27 = vld [vmem:[#allocation2 + $0x9] sm:$0xff] }
  0xd3   : > { %v299_v28 = vld [vmem:[#allocation2 + $0x8] sm:$0xff]  ;;  %1165 = vmatmul.mubr.msk.f32.vlgmr.msra.gmra.mxu0 %vm272_vm0, %v310_v27  ;;  %v659_v27 = vld [vmem:[#allocation9 + $0x110] sm:$0xff] }
  0xd4   : > { %v483_v29 = vld [vmem:[#allocation2 + $0x2] sm:$0xff]  ;;  %1186 = vmatmul.mubr.msk.f32.vlgmr.msra.gmra.mxu1 %vm272_vm0, %v299_v28  ;;  %1189 = vmatpush3.msra.mxu0 %v494_v21  ;;  %v484_v37 = vld [vmem:[#allocation2 + $0xa] sm:$0xff] }
  0xd5   : > { %1206 = vmatprep.mubr.msk.f32.mxu0 %vm272_vm0, %v483_v29  ;;  %1190 = vmatprep.subr.mxu0 %v493_v26 }
  0xd6   : > { %1191 = vmatpush3.msra.mxu0 %v493_v26  ;;  %685 = vmatpush1.msra.mxu1 %v658_v40 }
  0xd7   : > { %1192 = vmatprep.subr.mxu0 %v492_v30  ;;  %686 = vmatprep.subr.mxu1 %v1437_v0 }
  0xd8   : > { %1193 = vmatpush3.msra.mxu0 %v492_v30  ;;  %687 = vmatpush1.msra.mxu1 %v657_v41 }
  0xd9   : > { %1194 = vmatprep.subr.mxu0 %v491_v31  ;;  %688 = vmatprep.subr.mxu1 %v1437_v0 }
  0xda   : > { %1195 = vmatpush3.msra.mxu0 %v491_v31  ;;  %689 = vmatpush1.msra.mxu1 %v656_v43 }
  0xdb   : > { %1196 = vmatprep.subr.mxu0 %v490_v32  ;;  %690 = vmatprep.subr.mxu1 %v1437_v0 }
  0xdc   : > { %1197 = vmatpush3.msra.mxu0 %v490_v32  ;;  %691 = vmatpush1.msra.mxu1 %v655_v45  ;;  %v859_v45 = vld [vmem:[#allocation9 + $0x198] sm:$0xff] }
  0xdd   : > { %1198 = vmatprep.subr.mxu0 %v489_v33  ;;  %692 = vmatprep.subr.mxu1 %v1437_v0 }
  0xde   : > { %1199 = vmatpush3.msra.mxu0 %v489_v33  ;;  %693 = vmatpush1.msra.mxu1 %v654_v47 }
  0xdf   : > { %1200 = vmatprep.subr.mxu0 %v488_v34  ;;  %694 = vmatprep.subr.mxu1 %v1437_v0 }
  0xe0   : > { %1201 = vmatpush3.msra.mxu0 %v488_v34  ;;  %695 = vmatpush1.msra.mxu1 %v653_v49 }
  0xe1   : > { %1202 = vmatprep.subr.mxu0 %v487_v35  ;;  %696 = vmatprep.subr.mxu1 %v1437_v0 }
  0xe2   : > { %1203 = vmatpush3.msra.mxu0 %v487_v35  ;;  %697 = vmatpush1.msra.mxu1 %v652_v51  ;;  %v858_v51 = vld [vmem:[#allocation9 + $0x190] sm:$0xff] }
  0xe3   : > { %1204 = vmatprep.subr.mxu0 %v486_v36  ;;  %698 = vmatprep.subr.mxu1 %v1437_v0 }
  0xe4   : > { %1205 = vmatpush3.msra.mxu0 %v486_v36  ;;  %699 = vmatpush1.msra.mxu1 %v651_v53  ;;  %v857_v53 = vld [vmem:[#allocation9 + $0x188] sm:$0xff] }
  0xe5   : > { %1207 = vmatmul.mubr.msk.f32.vlgmr.msra.gmra.mxu0 %vm272_vm0, %v484_v37  ;;  %764 = vmatprep.subr.mxu0 %v1437_v0 }
  0xe6   : > { %765 = vmatpush1.msra.mxu0 %v635_v38  ;;  %700 = vmatprep.subr.mxu1 %v1437_v0 }
  0xe7   : > { %766 = vmatprep.subr.mxu0 %v1437_v0  ;;  %701 = vmatpush1.msra.mxu1 %v650_v55 }
  0xe8   : > { %767 = vmatpush1.msra.mxu0 %v634_v39  ;;  %702 = vmatprep.subr.mxu1 %v1437_v0 }
  0xe9   : > { %768 = vmatprep.subr.mxu0 %v1437_v0  ;;  %703 = vmatpush1.msra.mxu1 %v649_v61  ;;  %v852_v61 = vld [vmem:[#allocation9 + $0x160] sm:$0xff] }
  0xea   : > { %769 = vmatpush1.msra.mxu0 %v633_v42  ;;  %704 = vmatprep.subr.mxu1 %v1437_v0 }
  0xeb   : > { %770 = vmatprep.subr.mxu0 %v1437_v0  ;;  %705 = vmatpush1.msra.mxu1 %v648_v63  ;;  %v850_v63 = vld [vmem:[#allocation9 + $0x150] sm:$0xff] }
  0xec   : > { %771 = vmatpush1.msra.mxu0 %v632_v44  ;;  %706 = vmatprep.subr.mxu1 %v1437_v0 }
  0xed   : > { %772 = vmatprep.subr.mxu0 %v1437_v0  ;;  %707 = vmatpush1.msra.mxu1 %v647_v4  ;;  %v846_v4 = vld [vmem:[#allocation9 + $0x130] sm:$0xff] }
  0xee   : > { %773 = vmatpush1.msra.mxu0 %v631_v46  ;;  %708 = vmatprep.subr.mxu1 %v1437_v0 }
  0xef   : > { %774 = vmatprep.subr.mxu0 %v1437_v0  ;;  %709 = vmatpush1.msra.mxu1 %v646_v11  ;;  %v860_v11 = vld [vmem:[#allocation9 + $0x1a0] sm:$0xff] }
  0xf0   : > { %775 = vmatpush1.msra.mxu0 %v630_v48  ;;  %710 = vmatprep.subr.mxu1 %v1437_v0 }
  0xf1   : > { %776 = vmatprep.subr.mxu0 %v1437_v0  ;;  %711 = vmatpush1.msra.mxu1 %v645_v14 }
  0xf2   : > { %777 = vmatpush1.msra.mxu0 %v629_v50  ;;  %712 = vmatprep.subr.mxu1 %v1437_v0 }
  0xf3   : > { %778 = vmatprep.subr.mxu0 %v1437_v0  ;;  %713 = vmatpush1.msra.mxu1 %v644_v18 }
  0xf4   : > { %779 = vmatpush1.msra.mxu0 %v628_v52  ;;  %714 = vmatprep.subr.mxu1 %v1437_v0 }
  0xf5   : > { %780 = vmatprep.subr.mxu0 %v1437_v0  ;;  %715 = vmatpush1.msra.mxu1 %v643_v24 }
  0xf6   : > { %781 = vmatpush1.msra.mxu0 %v627_v54  ;;  %744 = vmatprep.subr.mxu1 %v1437_v0 }
  0xf7   : > { %782 = vmatprep.subr.mxu0 %v1437_v0  ;;  %745 = vmatpush2.msra.mxu1 %v660_v25 }
  0xf8   : > { %783 = vmatpush1.msra.mxu0 %v626_v56  ;;  %746 = vmatprep.subr.mxu1 %v1437_v0 }
  0xf9   : > { %784 = vmatprep.subr.mxu0 %v1437_v0  ;;  %747 = vmatpush2.msra.mxu1 %v659_v27 }
  0xfa   : > { %785 = vmatpush1.msra.mxu0 %v625_v57  ;;  %883 = vmatprep.subr.mxu1 %v1437_v0  ;;  %v856_v57 = vld [vmem:[#allocation9 + $0x180] sm:$0xff] }
  0xfb   : > { %786 = vmatprep.subr.mxu0 %v1437_v0 }
  0xfc   : > { %787 = vmatpush1.msra.mxu0 %v624_v58  ;;  %v855_v58 = vld [vmem:[#allocation9 + $0x178] sm:$0xff] }
  0xfd   : > { %788 = vmatprep.subr.mxu0 %v1437_v0 }
  0xfe   : > { %789 = vmatpush1.msra.mxu0 %v623_v62  ;;  %v851_v62 = vld [vmem:[#allocation9 + $0x158] sm:$0xff] }
  0xff   : > { %790 = vmatprep.subr.mxu0 %v1437_v0 }
 0x100   : > { %791 = vmatpush1.msra.mxu0 %v622_v1  ;;  %v849_v1 = vld [vmem:[#allocation9 + $0x148] sm:$0xff] }
 0x101   : > { %792 = vmatprep.subr.mxu0 %v1437_v0 }
 0x102   : > { %793 = vmatpush1.msra.mxu0 %v621_v5  ;;  %v845_v5 = vld [vmem:[#allocation9 + $0x128] sm:$0xff] }
 0x103   : > { %794 = vmatprep.subr.mxu0 %v1437_v0 }
 0x104   : > { %795 = vmatpush1.msra.mxu0 %v620_v12 }
 0x105   : > { %824 = vmatprep.subr.mxu0 %v1437_v0 }
 0x106   : > { %825 = vmatpush2.msra.mxu0 %v637_v15 }
 0x107   : > { %826 = vmatprep.subr.mxu0 %v1437_v0 }
 0x108   : > { %827 = vmatpush2.msra.mxu0 %v636_v19 }
 0x193   : > { %v1166_v59 = vpop.f32.mrf.mxu0 }
 0x194   : > { %v1187_v60 = vpop.f32.mrf.mxu1 }
 0x195   : > { %v393_v2 = vpop.f32.mrf.mxu0  ;;  %v480_v6 = vadd.f32 %v1187_v60, %v1166_v59  ;;  %v854_v59 = vld [vmem:[#allocation9 + $0x170] sm:$0xff]  ;;  %v853_v60 = vld [vmem:[#allocation9 + $0x168] sm:$0xff] }
 0x196   : > { %v474_v3 = vpop.f32.mrf.mxu1 }
 0x197   : > { %v475_v9 = vadd.f32 %v474_v3, %v393_v2  ;;  %v848_v2 = vld [vmem:[#allocation9 + $0x140] sm:$0xff]  ;;  %v847_v3 = vld [vmem:[#allocation9 + $0x138] sm:$0xff] }
 0x1a5   : > { %v1208_v7 = vpop.f32.mrf.mxu0 }
 0x1a6   : > { %v577_v10 = vadd.f32 %v1208_v7, %v480_v6  ;;  %v844_v6 = vld [vmem:[#allocation9 + $0x120] sm:$0xff]  ;;  %v861_v7 = vld [vmem:[#allocation9 + $0x1a8] sm:$0xff] }
 0x1a7   : > { %v567_v13 = vpop.f32.mrf.mxu0 }
 0x1a8   : > { %v586_v16 = vadd.f32 %v1098_v8, %v577_v10  ;;  %v576_v17 = vadd.f32 %v567_v13, %v475_v9 }
 0x1aa   : > { %v588_v20 = vmax.f32 %v586_v16, 0.0  ;;  %v585_v21 = vadd.f32 %v1098_v8, %v576_v17 }
 0x1ac   : > { %v593_v22 = vrot.slane %v588_v20, 7  ;;  %v587_v23 = vmax.f32 %v585_v21, 0.0 }
 0x1ae   : > { %599 = vrot.lane.b32.xlu0 %v593_v22, %s1439_s10  ;;  %v592_v26 = vrot.slane %v587_v23, 7 }
 0x1b0   : > { %595 = vrot.lane.b32.xlu1 %v592_v26, %s1439_s10  ;;  %v594_v28 = vsel %vm591_vm5, %v592_v26, %v593_v22 }
 0x1b4   : > { %597 = vrot.lane.b32.xlu1 %v594_v28, %s1439_s10  ;;  %v1105_v28 = vld [vmem:[%s1788_s4] ss:$0 sm:$0xff] }
 0x220   : > { %v600_v29 = vpop.permute.xlu0 %599 }
 0x221   : > { %613 = vst.msk [vmem:[#allocation3 + $0x20] sm:$0x1] %vm612_vm6, %v600_v29 }
 0x222   : > { %615 = vst.msk [vmem:[#allocation3 + $0x28] sm:$0x1] %vm614_vm7, %v600_v29  ;;  %v596_v30 = vpop.permute.xlu1 %595 }
 0x223   : > { %605 = vst.msk [vmem:[#allocation3] sm:$0xfe] %vm604_vm8, %v596_v30 }
 0x224   : > { %607 = vst.msk [vmem:[#allocation3 + $0x8] sm:$0xfe] %vm606_vm9, %v596_v30 }
 0x226   : > { %v598_v31 = vpop.permute.xlu1 %597 }
 0x227   : > { %609 = vst.msk [vmem:[#allocation3 + $0x10] sm:$0xff] %vm608_vm10, %v598_v31 }
 0x228   : > { %611 = vst.msk [vmem:[#allocation3 + $0x18] sm:$0xff] %vm610_vm11, %v598_v31  ;;  %v640_v47 = vld [vmem:[#allocation3 + $0x20] sm:$0x1] }
 0x229   : > { %v641_v38 = vld [vmem:[#allocation3 + $0x28] sm:$0x1]  ;;  %v674_v52 = vrot.slane %v640_v47, 1  ;;  %v841_v14 = vld [vmem:[#allocation3 + $0x20] sm:$0x3] }
 0x22a   : > { %v616_v33 = vld [vmem:[#allocation3] sm:$0xff]  ;;  %v676_v46 = vrot.slane %v641_v38, 1  ;;  %v842_v10 = vld [vmem:[#allocation3 + $0x28] sm:$0x3]  ;;  %v873_v17 = vrot.slane %v841_v14, 2 }
 0x22b   : > { %v617_v32 = vld [vmem:[#allocation3 + $0x8] sm:$0xff]  ;;  %v638_v35 = vld [vmem:[#allocation3] sm:$0xfe]  ;;  %v875_v13 = vrot.slane %v842_v10, 2 }
 0x22c   : > { %1101 = vmatprep.mubr.msk.f32.mxu0 %vm278_vm4, %v617_v32  ;;  %v639_v34 = vld [vmem:[#allocation3 + $0x8] sm:$0xfe]  ;;  %v668_v42 = vrot.slane %v638_v35, 1  ;;  %v839_v8 = vld [vmem:[#allocation3] sm:$0xfc] }
 0x22d   : > { %829 = vmatmul.mubr.f32.vlgmr.msra.gmra.mxu0 %v616_v33  ;;  %v671_v41 = vrot.slane %v639_v34, 1  ;;  %v840_v48 = vld [vmem:[#allocation3 + $0x8] sm:$0xfc]  ;;  %v867_v12 = vrot.slane %v839_v8, 2 }
 0x22e   : > { %v1687_v37 = vld [vmem:[#allocation3 + $0x10] sm:$0xff]  ;;  %v870_v54 = vrot.slane %v840_v48, 2 }
 0x22f   : > { %v1685_v36 = vld [vmem:[#allocation3 + $0x18] sm:$0xff]  ;;  %v669_v40 = vrot.slane %v1687_v37, 1  ;;  %v868_v9 = vrot.slane %v1687_v37, 2 }
 0x230   : > { %v672_v39 = vrot.slane %v1685_v36, 1  ;;  %1102 = vmatprep.mubr.msk.f32.mxu0 %vm278_vm4, %v1685_v36  ;;  %v871_v49 = vrot.slane %v1685_v36, 2 }
 0x231   : > { %834 = vmatmul.mubr.f32.gmra.mxu0 %v1687_v37  ;;  %v670_v44 = vsel %vm667_vm12, %v668_v42, %v669_v40  ;;  %v675_v55 = vsel %vm667_vm12, %v669_v40, %v674_v52  ;;  %v869_v15 = vsel %vm866_vm13, %v867_v12, %v868_v9  ;;  %v874_v18 = vsel %vm866_vm13, %v868_v9, %v873_v17 }
 0x232   : > { %v673_v43 = vsel %vm667_vm12, %v671_v41, %v672_v39  ;;  %v677_v50 = vsel %vm667_vm12, %v672_v39, %v676_v46  ;;  %v872_v56 = vsel %vm866_vm13, %v870_v54, %v871_v49  ;;  %v876_v16 = vsel %vm866_vm13, %v871_v49, %v875_v13 }
 0x233   : > { %1099 = vmatprep.mubr.msk.f32.mxu1 %vm278_vm4, %v673_v43 }
 0x234   : > { %749 = vmatmul.mubr.f32.vlgmr.msra.gmra.mxu1 %v670_v44 }
 0x235   : > { %884 = vmatpush1.msra.mxu1 %v859_v45  ;;  %1100 = vmatprep.mubr.msk.f32.mxu1 %vm278_vm4, %v677_v50 }
 0x236   : > { %885 = vmatprep.subr.mxu1 %v1437_v0 }
 0x237   : > { %886 = vmatpush1.msra.mxu1 %v858_v51 }
 0x238   : > { %887 = vmatprep.subr.mxu1 %v1437_v0  ;;  %754 = vmatmul.mubr.f32.gmra.mxu1 %v675_v55 }
 0x239   : > { %888 = vmatpush1.msra.mxu1 %v857_v53  ;;  %1103 = vmatprep.mubr.msk.f32.mxu1 %vm278_vm4, %v872_v56 }
 0x23a   : > { %889 = vmatprep.subr.mxu1 %v1437_v0 }
 0x23b   : > { %890 = vmatpush1.msra.mxu1 %v856_v57 }
 0x23c   : > { %891 = vmatprep.subr.mxu1 %v1437_v0 }
 0x23d   : > { %892 = vmatpush1.msra.mxu1 %v855_v58 }
 0x23e   : > { %893 = vmatprep.subr.mxu1 %v1437_v0 }
 0x23f   : > { %894 = vmatpush1.msra.mxu1 %v854_v59 }
 0x240   : > { %895 = vmatprep.subr.mxu1 %v1437_v0 }
 0x241   : > { %896 = vmatpush1.msra.mxu1 %v853_v60 }
 0x242   : > { %897 = vmatprep.subr.mxu1 %v1437_v0 }
 0x243   : > { %898 = vmatpush1.msra.mxu1 %v852_v61 }
 0x244   : > { %899 = vmatprep.subr.mxu1 %v1437_v0 }
 0x245   : > { %900 = vmatpush1.msra.mxu1 %v851_v62 }
 0x246   : > { %901 = vmatprep.subr.mxu1 %v1437_v0 }
 0x247   : > { %902 = vmatpush1.msra.mxu1 %v850_v63 }
 0x248   : > { %903 = vmatprep.subr.mxu1 %v1437_v0 }
 0x249   : > { %904 = vmatpush1.msra.mxu1 %v849_v1 }
 0x24a   : > { %905 = vmatprep.subr.mxu1 %v1437_v0 }
 0x24b   : > { %906 = vmatpush1.msra.mxu1 %v848_v2 }
 0x24c   : > { %907 = vmatprep.subr.mxu1 %v1437_v0 }
 0x24d   : > { %908 = vmatpush1.msra.mxu1 %v847_v3 }
 0x24e   : > { %909 = vmatprep.subr.mxu1 %v1437_v0 }
 0x24f   : > { %910 = vmatpush1.msra.mxu1 %v846_v4 }
 0x250   : > { %911 = vmatprep.subr.mxu1 %v1437_v0 }
 0x251   : > { %912 = vmatpush1.msra.mxu1 %v845_v5 }
 0x252   : > { %913 = vmatprep.subr.mxu1 %v1437_v0 }
 0x253   : > { %914 = vmatpush1.msra.mxu1 %v844_v6 }
 0x254   : > { %943 = vmatprep.subr.mxu1 %v1437_v0 }
 0x255   : > { %944 = vmatpush2.msra.mxu1 %v861_v7 }
 0x256   : > { %945 = vmatprep.subr.mxu1 %v1437_v0 }
 0x257   : > { %946 = vmatpush2.msra.mxu1 %v860_v11 }
 0x258   : > { %948 = vmatmul.mubr.f32.vlgmr.msra.gmra.mxu1 %v869_v15 }
 0x259   : > { %1104 = vmatprep.mubr.msk.f32.mxu1 %vm278_vm4, %v876_v16 }
 0x25c   : > { %953 = vmatmul.mubr.f32.gmra.mxu1 %v874_v18 }
 0x2ed   : > { %v830_v19 = vpop.f32.mrf.mxu0 }
 0x2ef   : > { %v832_v20 = vpop.f32.mrf.mxu0 }
 0x2f1   : > { %v835_v0 = vpop.f32.mrf.mxu0 }
 0x2f3   : > { %v837_v21 = vpop.f32.mrf.mxu0 }
 0x2f4   : > { %v750_v22 = vpop.f32.mrf.mxu1 }
 0x2f5   : > { %v831_v26 = vadd.f32 %v830_v19, %v750_v22 }
 0x2f6   : > { %v752_v23 = vpop.f32.mrf.mxu1 }
 0x2f8   : > { %v755_v24 = vpop.f32.mrf.mxu1 }
 0x2f9   : > { %v836_v31 = vadd.f32 %v835_v0, %v755_v24 }
 0x2fa   : > { %v757_v25 = vpop.f32.mrf.mxu1 }
 0x318   : > { %v949_v27 = vpop.f32.mrf.mxu1 }
 0x319   : > { %v958_v29 = vadd.f32 %v949_v27, %v831_v26 }
 0x31a   : > { %v951_v30 = vpop.f32.mrf.mxu1 }
 0x31b   : > { %v967_v32 = vadd.f32 %v1105_v28, %v958_v29 }
 0x31c   : > { %v954_v33 = vpop.f32.mrf.mxu1 }
 0x31d   : > { %v969_v34 = vmax.f32 %v967_v32, 0.0  ;;  %v959_v35 = vadd.f32 %v954_v33, %v836_v31 }
 0x31e   : > { %v956_v36 = vpop.f32.mrf.mxu1 }
 0x31f   : > { %971 = vst [vmem:[%s271_s6] sm:$0xff] %v969_v34  ;;  %v968_v37 = vadd.f32 %v1105_v28, %v959_v35 }
 0x321   : > { %v970_v38 = vmax.f32 %v968_v37, 0.0 }
 0x323   : > { %972 = vst [vmem:[%s271_s6 + $0x8] sm:$0xff] %v970_v38 }
 0x324   : > { %1375 = shalt.err (!%p1372_p3)
}
 0x325   : > { %s1376_s26 = scalar_lea.hbm %s1740_s16, 256  ;;  %s1380_s14 = scalar_lea.hbm %s1789_s5, 512 }
 0x326   : > { %p1377_p11 = scmp.ne.s32.totalorder %s1740_s16, %s1376_s26  ;;  %p1381_p4 = scmp.lt.s32.totalorder %s1740_s16, %s1789_s5 }
 0x327   : > { %p1382_p6 = scmp.lt.s32.totalorder %s1380_s14, %s1376_s26 }
 0x328   : > { %p1378_p9 = pnand %p1377_p11, %p1806_p2 }
 0x329   : > { %p1383_p8 = por %p1382_p6, %p1381_p4 }
 0x32a   : > { %p1379_p1 = pneg %p1378_p9 }
 0x32c   : > { %p1384_p5 = pnand %p1383_p8, %p1379_p1 }
 0x32e   : > { %1387 = shalt.err (!%p1384_p5)
}
 0x32f   : > { %s1441_s11 = smov 128  }
 0x330   : > { %1219 = dma.vmem_to_hbm [thread:$0]  (%p1806_p2), %s1735_s7, 256, %s1740_s16, %s974_s29, %s1441_s11, %s1441_s11, %s1439_s10  }
 0x331 PF: > { %s1002_s17 = sand.u32 1, %s1418_s18   ;;  %p1807_p7 = scmp.ne.s32.totalorder %s1796_s25, 0 }
 0x332   : > { %p1808_p12 = scmp.ge.s32.totalorder %s1430_s21, 2  ;;  %s1003_s8 = scalar_lea.sflag [#allocation6], %s1002_s17 }
 0x334   : > { %p1233_p13 = pnand %p1808_p12, %p1807_p7 }
 0x336   : > { %p1234_p0 = pneg %p1233_p13 }
 0x338   : > { %1413 = dma.done.wait (%p1234_p0), %s1003_s8, 256  }
 0x339   : > { %1415 = vsyncadd (%p1234_p0), %s1003_s8, 4294967040  ;;  %p19_p10 = scmp.ge.s32.totalorder %s1550_s15, 4   ;;  %s1809_s18 = smov %s1422_s19 }
 0x33a   : > { %s1810_s19 = smov %s1426_s20  ;;  %s1811_s20 = smov %s1566_s27 }
 0x33b   : > { %s1812_s21 = smov %s1550_s15  ;;  %21 = sbr.rel (!%p19_p10) target bundleno = 6 (0x6), region = 97 }
 0x340   :  { %1008 = vsyncpa [#allocation5], 1 }
 0x341   :  { %1010 = vsyncpa [#allocation5 + $0x1], 1 }
 0x342   :  { %1011 = vsyncpa [#allocation8], 1 }
 0x343   :  { %1012 = vsyncpa [#allocation6], 1 }
 0x344   :  { %1014 = vsyncpa [#allocation6 + $0x1], 1 }

</bundles_post_ra>
